<compile_context>
chip_gen: v6e
topology: v6e:2x2x1
jax: 0.10.0
libtpu: 0.0.40
codegen_flags: <defaults>
</compile_context>

<pallas_src>
import functools

import jax
import jax.numpy as jnp
from jax.experimental import pallas as pl
from jax.experimental.pallas import tpu as pltpu

HIDDEN = 128


def _round_up(n, m):
    return ((n + m - 1) // m) * m


def qnet_kernel(x_ref, w1_ref, b1_ref, w2_ref, b2_ref, w3_ref, b3_ref, o_ref):
    # Fused 3-layer MLP: bf16 matmuls on the MXU (f32 accumulation),
    # bias add + ReLU in f32 on the VPU. h1/h2 never leave VMEM/vregs.
    x = x_ref[...]                                                       # (TB, obs) bf16
    h1 = jnp.dot(x, w1_ref[...], preferred_element_type=jnp.float32) + b1_ref[...]
    h1 = jnp.maximum(h1, 0.0).astype(jnp.bfloat16)
    h2 = jnp.dot(h1, w2_ref[...], preferred_element_type=jnp.float32) + b2_ref[...]
    h2 = jnp.maximum(h2, 0.0).astype(jnp.bfloat16)
    out = jnp.dot(h2, w3_ref[...], preferred_element_type=jnp.float32) + b3_ref[...]
    o_ref[...] = out.astype(o_ref.dtype)                                 # (TB, act_dim) f32


@functools.partial(jax.jit, static_argnames=("tb_max",))
def qnetwork_forward(x, w1, b1, w2, b2, w3, b3, tb_max=2048):
    batch, obs_dim = x.shape
    act_dim = w3.shape[1]

    # --- Tile selection ------------------------------------------------------
    # Big tiles to amortize per-step overhead, but keep >=2 grid steps once the
    # batch is non-trivial so the "parallel" grid axis can shard across both
    # TensorCores on v7x.  tb is a multiple of 16 (bf16 sublane packing).
    min_tiles = pl.cdiv(batch, tb_max)
    num_tiles = max(min_tiles, 2) if batch > 16 else 1
    tb = _round_up(pl.cdiv(batch, num_tiles), 16)
    padded_batch = _round_up(batch, tb)
    grid = (padded_batch // tb,)

    # Pad / cast once in the wrapper (fused by XLA around the call).
    x_p = jnp.pad(x, ((0, padded_batch - batch), (0, 0))).astype(jnp.bfloat16)
    w1b = w1.astype(jnp.bfloat16)
    w2b = w2.astype(jnp.bfloat16)
    w3b = w3.astype(jnp.bfloat16)
    b1f = b1.astype(jnp.float32)
    b2f = b2.astype(jnp.float32)
    b3f = b3.astype(jnp.float32)

    # Weights/biases: same block for every grid step -> resident in VMEM, no re-DMA.
    resident = lambda shape: pl.BlockSpec(shape, lambda i: (0, 0))

    flops = 2 * padded_batch * (obs_dim * HIDDEN + HIDDEN * HIDDEN + HIDDEN * act_dim)
    bytes_accessed = (
        x_p.size * 2 + w1b.size * 2 + w2b.size * 2 + w3b.size * 2
        + b1f.size * 4 + b2f.size * 4 + b3f.size * 4
        + padded_batch * act_dim * 4
    )

    out = pl.pallas_call(
        qnet_kernel,
        out_shape=jax.ShapeDtypeStruct((padded_batch, act_dim), jnp.float32),
        grid=grid,
        in_specs=[
            pl.BlockSpec((tb, obs_dim), lambda i: (i, 0)),   # x: tiled over batch
            resident((obs_dim, HIDDEN)),
            resident((1, HIDDEN)),
            resident((HIDDEN, HIDDEN)),
            resident((1, HIDDEN)),
            resident((HIDDEN, act_dim)),                     # narrow final layer (no col pad)
            resident((1, act_dim)),
        ],
        out_specs=pl.BlockSpec((tb, act_dim), lambda i: (i, 0)),
        compiler_params=pltpu.CompilerParams(
            dimension_semantics=("parallel",),               # megacore sharding on v7x
        ),
        cost_estimate=pl.CostEstimate(
            flops=flops, transcendentals=0, bytes_accessed=bytes_accessed),
    )(x_p, w1b, b1f, w2b, b2f, w3b, b3f)

    # Only slice when the batch was actually padded (avoids an extra HBM pass).
    if padded_batch != batch:
        out = out[:batch]
    return out


def init_params(key, obs_dim, act_dim):
    """Deterministic init mimicking PyTorch nn.Linear default (U[-1/sqrt(fan_in), +])."""
    ks = jax.random.split(key, 6)

    def linear(kw, kb, fan_in, fan_out):
        bound = 1.0 / jnp.sqrt(jnp.float32(fan_in))
        w = jax.random.uniform(kw, (fan_in, fan_out), jnp.float32, -bound, bound)
        b = jax.random.uniform(kb, (1, fan_out), jnp.float32, -bound, bound)
        return w, b

    w1, b1 = linear(ks[0], ks[1], obs_dim, HIDDEN)
    w2, b2 = linear(ks[2], ks[3], HIDDEN, HIDDEN)
    w3, b3 = linear(ks[4], ks[5], HIDDEN, act_dim)
    return w1, b1, w2, b2, w3, b3


def reference_forward(x, w1, b1, w2, b2, w3, b3):
    """Pure-JAX reference mimicking the kernel's bf16-storage / f32-accumulate numerics.
    Note: bf16 MXU inputs diverge from PyTorch's f32 nn.Linear by ~1e-2 relative."""
    bf = lambda a: a.astype(jnp.bfloat16).astype(jnp.float32)
    dot = functools.partial(jnp.dot, precision=jax.lax.Precision.HIGHEST)
    h1 = jnp.maximum(dot(bf(x), bf(w1)) + b1, 0.0)
    h2 = jnp.maximum(dot(bf(h1), bf(w2)) + b2, 0.0)
    return dot(bf(h2), bf(w3)) + b3


if __name__ == "__main__":
    key = jax.random.PRNGKey(0)
    k_x, k_x2, k_p = jax.random.split(key, 3)

    batch, obs_dim, act_dim = 8, 16, 4
    x = jax.random.normal(k_x, (batch, obs_dim), jnp.float32)
    params = init_params(k_p, obs_dim, act_dim)

    # Single-tile path (small batch).
    out = qnetwork_forward(x, *params)
    out = jax.block_until_ready(out)
    assert out.shape == (batch, act_dim)
    ref = reference_forward(x, *params)
    assert jnp.allclose(out, ref, atol=2e-2, rtol=2e-2), (
        f"max abs err {jnp.max(jnp.abs(out - ref))}")

    # Multi-tile path (grid > 1, batch padding exercised).
    batch2 = 48
    x2 = jax.random.normal(k_x2, (batch2, obs_dim), jnp.float32)
    out2 = jax.block_until_ready(qnetwork_forward(x2, *params))
    assert out2.shape == (batch2, act_dim)
    ref2 = reference_forward(x2, *params)
    assert jnp.allclose(out2, ref2, atol=2e-2, rtol=2e-2), (
        f"max abs err {jnp.max(jnp.abs(out2 - ref2))}")

    print("KERNEL_OK")
</pallas_src>

<mosaic_0001>
module attributes {stable_mosaic.version = 11 : i64} {
  func.func @qnet_kernel(%arg0: i32, %arg1: memref<16x16xbf16, #tpu.memory_space<vmem>>, %arg2: memref<16x128xbf16, #tpu.memory_space<vmem>>, %arg3: memref<1x128xf32, #tpu.memory_space<vmem>>, %arg4: memref<128x128xbf16, #tpu.memory_space<vmem>>, %arg5: memref<1x128xf32, #tpu.memory_space<vmem>>, %arg6: memref<128x4xbf16, #tpu.memory_space<vmem>>, %arg7: memref<1x4xf32, #tpu.memory_space<vmem>>, %arg8: memref<16x4xf32, #tpu.memory_space<vmem>>) attributes {dimension_semantics = [#tpu.dimension_semantics<parallel>], iteration_bounds = array<i64: 1>, scalar_prefetch = 0 : i64, scratch_operands = 0 : i64, tpu.core_type = #tpu.core_type<tc>, window_params = [{transform_indices = @transform_0, window_bounds = array<i64: 16, 16>}, {pipeline_mode = #tpu.pipeline_mode<synchronous>, transform_indices = @transform_1, window_bounds = array<i64: 16, 128>}, {pipeline_mode = #tpu.pipeline_mode<synchronous>, transform_indices = @transform_2, window_bounds = array<i64: 1, 128>}, {pipeline_mode = #tpu.pipeline_mode<synchronous>, transform_indices = @transform_3, window_bounds = array<i64: 128, 128>}, {pipeline_mode = #tpu.pipeline_mode<synchronous>, transform_indices = @transform_4, window_bounds = array<i64: 1, 128>}, {pipeline_mode = #tpu.pipeline_mode<synchronous>, transform_indices = @transform_5, window_bounds = array<i64: 128, 4>}, {pipeline_mode = #tpu.pipeline_mode<synchronous>, transform_indices = @transform_6, window_bounds = array<i64: 1, 4>}, {transform_indices = @transform_7, window_bounds = array<i64: 16, 4>}]} {
    %c0 = arith.constant 0 : index
    %c0_0 = arith.constant 0 : index
    %0 = vector.load %arg1[%c0, %c0_0] : memref<16x16xbf16, #tpu.memory_space<vmem>>, vector<16x16xbf16>
    %c0_1 = arith.constant 0 : index
    %c0_2 = arith.constant 0 : index
    %1 = vector.load %arg2[%c0_1, %c0_2] : memref<16x128xbf16, #tpu.memory_space<vmem>>, vector<16x128xbf16>
    %cst = arith.constant dense<0.000000e+00> : vector<16x128xf32>
    %2 = tpu.matmul %0, %1, %cst {dimension_numbers = #tpu.dot_dimension_numbers<[1], [0], [0], [1], [0, 0, 1, 1], [], []>} : vector<16x16xbf16>, vector<16x128xbf16>, vector<16x128xf32> -> vector<16x128xf32>
    %c0_3 = arith.constant 0 : index
    %c0_4 = arith.constant 0 : index
    %3 = vector.load %arg3[%c0_3, %c0_4] : memref<1x128xf32, #tpu.memory_space<vmem>>, vector<1x128xf32>
    %4 = vector.broadcast %3 : vector<1x128xf32> to vector<16x128xf32>
    %5 = arith.addf %2, %4 : vector<16x128xf32>
    %cst_5 = arith.constant 0.000000e+00 : f32
    %6 = vector.broadcast %cst_5 : f32 to vector<16x128xf32>
    %7 = arith.maximumf %5, %6 : vector<16x128xf32>
    %8 = arith.truncf %7 : vector<16x128xf32> to vector<16x128xbf16>
    %c0_6 = arith.constant 0 : index
    %c0_7 = arith.constant 0 : index
    %9 = vector.load %arg4[%c0_6, %c0_7] : memref<128x128xbf16, #tpu.memory_space<vmem>>, vector<128x128xbf16>
    %cst_8 = arith.constant dense<0.000000e+00> : vector<16x128xf32>
    %10 = tpu.matmul %8, %9, %cst_8 {dimension_numbers = #tpu.dot_dimension_numbers<[1], [0], [0], [1], [0, 0, 1, 1], [], []>} : vector<16x128xbf16>, vector<128x128xbf16>, vector<16x128xf32> -> vector<16x128xf32>
    %c0_9 = arith.constant 0 : index
    %c0_10 = arith.constant 0 : index
    %11 = vector.load %arg5[%c0_9, %c0_10] : memref<1x128xf32, #tpu.memory_space<vmem>>, vector<1x128xf32>
    %12 = vector.broadcast %11 : vector<1x128xf32> to vector<16x128xf32>
    %13 = arith.addf %10, %12 : vector<16x128xf32>
    %cst_11 = arith.constant 0.000000e+00 : f32
    %14 = vector.broadcast %cst_11 : f32 to vector<16x128xf32>
    %15 = arith.maximumf %13, %14 : vector<16x128xf32>
    %16 = arith.truncf %15 : vector<16x128xf32> to vector<16x128xbf16>
    %c0_12 = arith.constant 0 : index
    %c0_13 = arith.constant 0 : index
    %17 = vector.load %arg6[%c0_12, %c0_13] : memref<128x4xbf16, #tpu.memory_space<vmem>>, vector<128x4xbf16>
    %cst_14 = arith.constant dense<0.000000e+00> : vector<16x4xf32>
    %18 = tpu.matmul %16, %17, %cst_14 {dimension_numbers = #tpu.dot_dimension_numbers<[1], [0], [0], [1], [0, 0, 1, 1], [], []>} : vector<16x128xbf16>, vector<128x4xbf16>, vector<16x4xf32> -> vector<16x4xf32>
    %c0_15 = arith.constant 0 : index
    %c0_16 = arith.constant 0 : index
    %19 = vector.load %arg7[%c0_15, %c0_16] : memref<1x4xf32, #tpu.memory_space<vmem>>, vector<1x4xf32>
    %20 = vector.broadcast %19 : vector<1x4xf32> to vector<16x4xf32>
    %21 = arith.addf %18, %20 : vector<16x4xf32>
    %c0_17 = arith.constant 0 : index
    %c0_18 = arith.constant 0 : index
    %22 = vector.load %arg8[%c0_17, %c0_18] : memref<16x4xf32, #tpu.memory_space<vmem>>, vector<16x4xf32>
    tpu.vector_store %arg8[%c0_17, %c0_18], %21 {strides = array<i32>} : memref<16x4xf32, #tpu.memory_space<vmem>>, vector<16x4xf32>,
    return
  }
  func.func @transform_0(%arg0: i32) -> (i32, i32) {
    %c0_i32 = arith.constant 0 : i32
    %c0_i32_0 = arith.constant 0 : i32
    return %arg0, %c0_i32 : i32, i32
  }
  func.func @transform_1(%arg0: i32) -> (i32, i32) {
    %c0_i32 = arith.constant 0 : i32
    %c0_i32_0 = arith.constant 0 : i32
    %c0_i32_1 = arith.constant 0 : i32
    return %c0_i32, %c0_i32_0 : i32, i32
  }
  func.func @transform_2(%arg0: i32) -> (i32, i32) {
    %c0_i32 = arith.constant 0 : i32
    %c0_i32_0 = arith.constant 0 : i32
    %c0_i32_1 = arith.constant 0 : i32
    return %c0_i32, %c0_i32_0 : i32, i32
  }
  func.func @transform_3(%arg0: i32) -> (i32, i32) {
    %c0_i32 = arith.constant 0 : i32
    %c0_i32_0 = arith.constant 0 : i32
    %c0_i32_1 = arith.constant 0 : i32
    return %c0_i32, %c0_i32_0 : i32, i32
  }
  func.func @transform_4(%arg0: i32) -> (i32, i32) {
    %c0_i32 = arith.constant 0 : i32
    %c0_i32_0 = arith.constant 0 : i32
    %c0_i32_1 = arith.constant 0 : i32
    return %c0_i32, %c0_i32_0 : i32, i32
  }
  func.func @transform_5(%arg0: i32) -> (i32, i32) {
    %c0_i32 = arith.constant 0 : i32
    %c0_i32_0 = arith.constant 0 : i32
    %c0_i32_1 = arith.constant 0 : i32
    return %c0_i32, %c0_i32_0 : i32, i32
  }
  func.func @transform_6(%arg0: i32) -> (i32, i32) {
    %c0_i32 = arith.constant 0 : i32
    %c0_i32_0 = arith.constant 0 : i32
    %c0_i32_1 = arith.constant 0 : i32
    return %c0_i32, %c0_i32_0 : i32, i32
  }
  func.func @transform_7(%arg0: i32) -> (i32, i32) {
    %c0_i32 = arith.constant 0 : i32
    %c0_i32_0 = arith.constant 0 : i32
    return %arg0, %c0_i32 : i32, i32
  }
}

</mosaic_0001>

<bundles_post_ra>
// kernel: qnetwork_forward.1
= control target key start
LH: loop header
LB: loop body
LE: loop exit
PB: predicated region body
PF: predicated region fallthrough
CT: control target
= control target key end

     0   :  { %v439_v0 = vmov 0.0   ;;  %vm440_vm0 = vmmov 0   ;;  %vm49_vm1 = vcmask 130048   ;;  %vm324_vm2 = vcmask 31744   ;;  %s570_s1 = inlined_call_operand.vmem [shape: bf16[16,128], index: 1, kind: input, shape index: {}]   ;;  %s571_s0 = inlined_call_operand.vmem [shape: bf16[16,16], index: 0, kind: input, shape index: {}]   ;;  %s572_s3 = inlined_call_operand.vmem [shape: bf16[128,128], index: 3, kind: input, shape index: {}]   ;;  %s573_s5 = inlined_call_operand.vmem [shape: bf16[128,4], index: 5, kind: input, shape index: {}]   ;;  %s574_s2 = inlined_call_operand.vmem [shape: f32[1,128], index: 2, kind: input, shape index: {}]   ;;  %s575_s4 = inlined_call_operand.vmem [shape: f32[1,128], index: 4, kind: input, shape index: {}]   ;;  %s576_s6 = inlined_call_operand.vmem [shape: f32[1,4], index: 6, kind: input, shape index: {}]   ;;  %s577_s7 = inlined_call_operand.vmem [shape: f32[16,4], index: 7, kind: output, shape index: {}]  }
   0x1   :  { %373 = vmatprep.subr.bf16.mxu0 %v439_v0  ;;  %v421_v1 = vld [vmem:[%s570_s1] sm:$0xff]   ;;  %375 = vmatprep.mubr.msk.bf16.mxu0 %vm440_vm0, %v439_v0  ;;  %v423_v3 = vld [vmem:[%s572_s3 + $0x38] sm:$0xff]   ;;  %v424_v4 = vld [vmem:[%s572_s3 + $0x30] sm:$0xff]  }
   0x2   :  { %v422_v2 = vld [vmem:[%s571_s0] sm:$0xff]   ;;  %379 = vmatprep.subr.bf16.mxu1 %v439_v0  ;;  %395 = vmatprep.mubr.msk.bf16.mxu1 %vm440_vm0, %v439_v0  ;;  %v425_v5 = vld [vmem:[%s572_s3 + $0x28] sm:$0xff]   ;;  %v427_v7 = vld [vmem:[%s572_s3 + $0x18] sm:$0xff]  }
   0x3   :  { %374 = vmatpush3.bf16.msra.mxu0 %v421_v1  ;;  %380 = vmatpush3.bf16.msra.mxu1 %v423_v3  ;;  %v426_v6 = vld [vmem:[%s572_s3 + $0x20] sm:$0xff]   ;;  %v428_v8 = vld [vmem:[%s572_s3 + $0x10] sm:$0xff]   ;;  %v429_v9 = vld [vmem:[%s572_s3 + $0x8] sm:$0xff]  }
   0x4   :  { %399 = vmatprep.subr.bf16.mxu0 %v439_v0  ;;  %381 = vmatprep.subr.bf16.mxu1 %v439_v0  ;;  %v430_v10 = vld [vmem:[%s572_s3] sm:$0xff]   ;;  %v431_v11 = vld [vmem:[%s573_s5 + $0x38] sm:$0xff]   ;;  %v432_v12 = vld [vmem:[%s573_s5 + $0x30] sm:$0xff]  }
   0x5   :  { %v433_v13 = vld [vmem:[%s573_s5 + $0x28] sm:$0xff]   ;;  %v434_v14 = vld [vmem:[%s573_s5 + $0x20] sm:$0xff]   ;;  %v435_v15 = vld [vmem:[%s573_s5 + $0x18] sm:$0xff]  }
   0x6   :  { %376 = vmatmul.mubr.msk.bf16.vlgmr.msra.gmra.mxu0 %vm49_vm1, %v422_v2  ;;  %v331_v16 = vld [vmem:[%s574_s2] ss:$0 sm:$0xff]  ;;  %v436_v26 = vld [vmem:[%s573_s5 + $0x10] sm:$0xff]   ;;  %v437_v27 = vld [vmem:[%s573_s5 + $0x8] sm:$0xff]  }
   0x7   :  { %415 = vmatprep.mubr.msk.bf16.mxu0 %vm440_vm0, %v439_v0  ;;  %382 = vmatpush3.bf16.msra.mxu1 %v424_v4  ;;  %v438_v28 = vld [vmem:[%s573_s5] sm:$0xff]  }
   0x8   :  { %383 = vmatprep.subr.bf16.mxu1 %v439_v0  ;;  %400 = vmatpush3.bf16.msra.mxu0 %v431_v11  ;;  %v335_v29 = vld [vmem:[%s575_s4] ss:$0 sm:$0xff] }
   0x9   :  { %401 = vmatprep.subr.bf16.mxu0 %v439_v0  ;;  %v344_v39 = vld [vmem:[%s576_s6] ss:$0 sm:$0xff] }
   0xb   :  { %384 = vmatpush3.bf16.msra.mxu1 %v425_v5 }
   0xc   :  { %385 = vmatprep.subr.bf16.mxu1 %v439_v0  ;;  %402 = vmatpush3.bf16.msra.mxu0 %v432_v12 }
   0xd   :  { %403 = vmatprep.subr.bf16.mxu0 %v439_v0 }
   0xf   :  { %386 = vmatpush3.bf16.msra.mxu1 %v426_v6 }
  0x10   :  { %387 = vmatprep.subr.bf16.mxu1 %v439_v0  ;;  %404 = vmatpush3.bf16.msra.mxu0 %v433_v13 }
  0x11   :  { %405 = vmatprep.subr.bf16.mxu0 %v439_v0 }
  0x13   :  { %388 = vmatpush3.bf16.msra.mxu1 %v427_v7 }
  0x14   :  { %389 = vmatprep.subr.bf16.mxu1 %v439_v0  ;;  %406 = vmatpush3.bf16.msra.mxu0 %v434_v14 }
  0x15   :  { %407 = vmatprep.subr.bf16.mxu0 %v439_v0 }
  0x17   :  { %390 = vmatpush3.bf16.msra.mxu1 %v428_v8 }
  0x18   :  { %391 = vmatprep.subr.bf16.mxu1 %v439_v0  ;;  %408 = vmatpush3.bf16.msra.mxu0 %v435_v15 }
  0x19   :  { %409 = vmatprep.subr.bf16.mxu0 %v439_v0 }
  0x1b   :  { %392 = vmatpush3.bf16.msra.mxu1 %v429_v9 }
  0x1c   :  { %393 = vmatprep.subr.bf16.mxu1 %v439_v0  ;;  %410 = vmatpush3.bf16.msra.mxu0 %v436_v26 }
  0x1d   :  { %411 = vmatprep.subr.bf16.mxu0 %v439_v0 }
  0x1f   :  { %394 = vmatpush3.bf16.msra.mxu1 %v430_v10 }
  0x20   :  { %412 = vmatpush3.bf16.msra.mxu0 %v437_v27 }
  0x21   :  { %413 = vmatprep.subr.bf16.mxu0 %v439_v0 }
  0x24   :  { %414 = vmatpush3.bf16.msra.mxu0 %v438_v28 }
  0xc6   :  { %v87_v17 = vpop.f32.mrf.mxu0 }
  0xc7   :  { %v88_v19 = vadd.f32 %v331_v16, %v87_v17 }
  0xc8   :  { %v377_v18 = vpop.f32.mrf.mxu0 }
  0xc9   :  { %v94_v23 = vmax.f32 %v88_v19, 0.0 }
  0xca   :  { %v90_v20 = vpop.f32.mrf.mxu0 }
  0xcb   :  { %v91_v21 = vadd.f32 %v331_v16, %v90_v20 }
  0xcc   :  { %v378_v22 = vpop.f32.mrf.mxu0 }
  0xcd   :  { %v95_v24 = vmax.f32 %v91_v21, 0.0 }
  0xcf   :  { %v96_v25 = vpack.c.bf16 %v95_v24, %v94_v23 }
  0xd1   :  { %396 = vmatmul.mubr.bf16.vlgmr.msra.gmra.mxu1 %v96_v25 }
 0x191   :  { %v202_v30 = vpop.f32.mrf.mxu1 }
 0x192   :  { %v203_v32 = vadd.f32 %v335_v29, %v202_v30 }
 0x193   :  { %v397_v31 = vpop.f32.mrf.mxu1 }
 0x194   :  { %v209_v36 = vmax.f32 %v203_v32, 0.0 }
 0x195   :  { %v205_v33 = vpop.f32.mrf.mxu1 }
 0x196   :  { %v206_v34 = vadd.f32 %v335_v29, %v205_v33 }
 0x197   :  { %v398_v35 = vpop.f32.mrf.mxu1 }
 0x198   :  { %v210_v37 = vmax.f32 %v206_v34, 0.0 }
 0x19a   :  { %v211_v38 = vpack.c.bf16 %v210_v37, %v209_v36 }
 0x19c   :  { %416 = vmatmul.mubr.bf16.vlgmr.msra.gmra.mxu0 %v211_v38 }
 0x25c   :  { %v317_v40 = vpop.f32.mrf.mxu0 }
 0x25d   :  { %v318_v41 = vadd.f32 %v344_v39, %v317_v40 }
 0x25e   :  { %v417_v42 = vpop.f32.mrf.mxu0 }
 0x25f   :  { %325 = vst.msk [vmem:[%s577_s7] sm:$0xff] %vm324_vm2, %v318_v41 }
 0x260   :  { %v320_v43 = vpop.f32.mrf.mxu0 }
 0x261   :  { %v321_v44 = vadd.f32 %v344_v39, %v320_v43 }
 0x262   :  { %v418_v45 = vpop.f32.mrf.mxu0 }
 0x263   :  { %326 = vst.msk [vmem:[%s577_s7 + $0x8] sm:$0xff] %vm324_vm2, %v321_v44 }

</bundles_post_ra>
